<compile_context>
chip_gen: v5e
topology: v5e:2x2
jax: 0.10.0
libtpu: 0.0.40
codegen_flags: <defaults>
</compile_context>

<pallas_src>
import jax
import jax.numpy as jnp
from jax.experimental import pallas as pl
from jax.experimental.pallas import tpu as pltpu


def iacnet_kernel(x_ref, wc_ref, bc_ref, wh_ref, bh_ref, out_ref, feat_sc):
    # One grid step = one batch tile:
    #   x_ref:   (Bt, C, S)   inputs, spatial S lane-dense
    #   wc_ref:  (C, F)       1x1-conv weight, 1/S pool scale folded in
    #   bc_ref:  (1, F)       1x1-conv bias,   1/S pool scale folded in
    #   wh_ref:  (F, SLAB)    [ 0 | Wcls | Wiac | 0 ]  fused head weights
    #   bh_ref:  (1, SLAB)    [ 0 | bcls | biac | 0 ]  fused head biases
    #   out_ref: (Bt, SLAB)   [ feat | logits | logits_inver_aux | 0 ]
    #   feat_sc: (Bt, F)      VMEM scratch for pooled features
    bt = x_ref.shape[0]
    num_feat = wc_ref.shape[1]
    wc = wc_ref[...]                       # loaded once per tile
    bc = bc_ref[...]

    @pl.loop(0, bt)
    def _(b):
        xb = x_ref[b]                      # (C, S)
        # Channel mix on the MXU (K = C). Contracting dim 0 of both operands
        # yields h directly in (S, F) layout, so the pooled feature below is
        # already a lane-dense row (no per-element transpose / relayout).
        h = jax.lax.dot_general(
            xb, wc,
            dimension_numbers=(((0,), (0,)), ((), ())),
            preferred_element_type=jnp.float32)        # (S, F)
        h = jnp.maximum(h + bc, 0.0)                   # bias + ReLU on the VPU
        # Global average pool: 1/S already folded into wc/bc -> plain sum.
        feat_sc[pl.ds(b, 1), :] = jnp.sum(h, axis=0, keepdims=True)

    feat = feat_sc[...]                                # (Bt, F) exact f32
    # ONE fused head matmul for the whole tile -> lane-dense (Bt, SLAB) slab.
    heads = jnp.dot(feat, wh_ref[...],
                    preferred_element_type=jnp.float32) + bh_ref[...]
    out_ref[...] = heads.astype(out_ref.dtype)
    # feat columns bypass the MXU entirely (exact passthrough, no bf16 pass).
    out_ref[:, 0:num_feat] = feat.astype(out_ref.dtype)


def _choose_batch_tile(batch, bt_max=512):
    # Single tile when tiny (block dim == full array dim is always legal).
    if batch <= 8:
        return batch
    # Otherwise: multiple of 8 (f32 sublane tile), >= 2 tiles so both v7x
    # TensorCores get work, capped so 2x double-buffered x tiles stay well
    # under the 16 MiB default scoped-VMEM limit on v5e (Bt=512 -> ~9 MiB).
    bt = (max(batch // 2, 8) // 8) * 8
    return max(8, min(bt_max, bt))


def pack_params(params, spatial):
    """One-time parameter repack (hoisted out of the forward path)."""
    F = params['wc'].shape[1]
    NC = params['wcls'].shape[1]
    slab = ((F + 2 * NC + 127) // 128) * 128
    inv_s = 1.0 / float(spatial)
    # ReLU is positively homogeneous: max(z/S, 0) = max(z, 0)/S, so the pool
    # scale folds into the conv weight/bias and the in-kernel pool is a sum.
    wc_s = (params['wc'] * inv_s).astype(jnp.float32)        # (C, F)
    bc_s = (params['bc'] * inv_s).astype(jnp.float32)        # (1, F)
    w_heads = jnp.zeros((F, slab), jnp.float32)
    w_heads = w_heads.at[:, F:F + NC].set(params['wcls'])
    w_heads = w_heads.at[:, F + NC:F + 2 * NC].set(params['wiac'])
    b_heads = jnp.zeros((1, slab), jnp.float32)
    b_heads = b_heads.at[:, F:F + NC].set(params['bcls'])
    b_heads = b_heads.at[:, F + NC:F + 2 * NC].set(params['biac'])
    return {'wc_s': wc_s, 'bc_s': bc_s, 'w_heads': w_heads, 'b_heads': b_heads,
            'slab': slab, 'num_features': F, 'num_classes': NC}


def iacnet_forward(x_nchw, packed, *, bt_max=512):
    """x_nchw: (B, C, H, W) float32. Returns dict like IACNet.forward."""
    B, C, H, W = x_nchw.shape
    S = H * W
    F = packed['num_features']
    NC = packed['num_classes']
    slab = packed['slab']

    # NCHW -> (B, C, H*W): a FREE reshape (no transpose); spatial on lanes.
    x = x_nchw.reshape(B, C, S)

    bt = _choose_batch_tile(B, bt_max)
    n_tiles = (B + bt - 1) // bt
    b_pad = n_tiles * bt
    if b_pad != B:
        x = jnp.pad(x, ((0, b_pad - B), (0, 0), (0, 0)))

    out = pl.pallas_call(
        iacnet_kernel,
        out_shape=jax.ShapeDtypeStruct((b_pad, slab), jnp.float32),
        grid=(n_tiles,),
        in_specs=[
            pl.BlockSpec((bt, C, S), lambda i: (i, 0, 0)),   # x batch tile
            pl.BlockSpec((C, F), lambda i: (0, 0)),          # conv weight (resident)
            pl.BlockSpec((1, F), lambda i: (0, 0)),          # conv bias (resident)
            pl.BlockSpec((F, slab), lambda i: (0, 0)),       # fused head weights
            pl.BlockSpec((1, slab), lambda i: (0, 0)),       # fused head biases
        ],
        out_specs=pl.BlockSpec((bt, slab), lambda i: (i, 0)),
        scratch_shapes=[pltpu.VMEM((bt, F), jnp.float32)],
        compiler_params=pltpu.CompilerParams(
            dimension_semantics=("parallel",)),              # 2-TC sharding on v7x
    )(x, packed['wc_s'], packed['bc_s'], packed['w_heads'], packed['b_heads'])

    out = out[:B]
    feat = out[:, :F]
    logits = out[:, F:F + NC]
    logits_iac = out[:, F + NC:F + 2 * NC]
    return {'feat': feat, 'logits': logits, 'logits_inver_aux': logits_iac}


def init_params(key, c_in, num_features, num_classes):
    ks = jax.random.split(key, 6)
    scale = 0.05
    return {
        # synthetic backbone: 1x1 conv weights (C_in -> num_features)
        'wc': scale * jax.random.normal(ks[0], (c_in, num_features), jnp.float32),
        'bc': scale * jax.random.normal(ks[1], (1, num_features), jnp.float32),
        # backbone classifier head (stored as (F, NC))
        'wcls': scale * jax.random.normal(ks[2], (num_features, num_classes), jnp.float32),
        'bcls': scale * jax.random.normal(ks[3], (1, num_classes), jnp.float32),
        # inver_aux_classifier = nn.Linear(num_features, num_classes), as (F, NC)
        'wiac': scale * jax.random.normal(ks[4], (num_features, num_classes), jnp.float32),
        'biac': scale * jax.random.normal(ks[5], (1, num_classes), jnp.float32),
    }


if __name__ == "__main__":
    # TODO(synk): real IACNet wraps an arbitrary semilearn backbone; a minimal
    # synthetic conv+pool backbone stands in so the full forward fits in one
    # Pallas kernel. group_matcher() is optimizer bookkeeping with no kernel
    # equivalent.
    B, C, H, W = 2, 4, 16, 16
    NUM_FEATURES, NUM_CLASSES = 32, 8

    key = jax.random.PRNGKey(0)
    kx, kp = jax.random.split(key)
    x = jax.random.normal(kx, (B, C, H, W), jnp.float32)
    params = init_params(kp, C, NUM_FEATURES, NUM_CLASSES)

    packed = pack_params(params, H * W)          # one-time repack (hoisted)
    out = iacnet_forward(x, packed)
    jax.block_until_ready(out)

    # pure-JAX reference check (original NHWC formulation)
    xr = jnp.transpose(x, (0, 2, 3, 1)).reshape(B, H * W, C)
    h = jnp.maximum(jnp.einsum('bsc,cf->bsf', xr, params['wc']) + params['bc'], 0.0)
    feat_ref = jnp.mean(h, axis=1)
    logits_ref = feat_ref @ params['wcls'] + params['bcls']
    iac_ref = feat_ref @ params['wiac'] + params['biac']

    assert out['feat'].shape == (B, NUM_FEATURES)
    assert out['logits'].shape == (B, NUM_CLASSES)
    assert out['logits_inver_aux'].shape == (B, NUM_CLASSES)
    assert jnp.allclose(out['feat'], feat_ref, atol=2e-4)
    assert jnp.allclose(out['logits'], logits_ref, atol=2e-4)
    assert jnp.allclose(out['logits_inver_aux'], iac_ref, atol=2e-4)

    print("KERNEL_OK")
</pallas_src>

<mosaic_0001>
module attributes {stable_mosaic.version = 11 : i64} {
  func.func @iacnet_kernel(%arg0: i32, %arg1: memref<2x4x256xf32, #tpu.memory_space<vmem>>, %arg2: memref<4x32xf32, #tpu.memory_space<vmem>>, %arg3: memref<1x32xf32, #tpu.memory_space<vmem>>, %arg4: memref<32x128xf32, #tpu.memory_space<vmem>>, %arg5: memref<1x128xf32, #tpu.memory_space<vmem>>, %arg6: memref<2x128xf32, #tpu.memory_space<vmem>>, %arg7: memref<2x32xf32, #tpu.memory_space<vmem>>) attributes {dimension_semantics = [#tpu.dimension_semantics<parallel>], iteration_bounds = array<i64: 1>, scalar_prefetch = 0 : i64, scratch_operands = 1 : i64, tpu.core_type = #tpu.core_type<tc>, window_params = [{transform_indices = @transform_0, window_bounds = array<i64: 2, 4, 256>}, {pipeline_mode = #tpu.pipeline_mode<synchronous>, transform_indices = @transform_1, window_bounds = array<i64: 4, 32>}, {pipeline_mode = #tpu.pipeline_mode<synchronous>, transform_indices = @transform_2, window_bounds = array<i64: 1, 32>}, {pipeline_mode = #tpu.pipeline_mode<synchronous>, transform_indices = @transform_3, window_bounds = array<i64: 32, 128>}, {pipeline_mode = #tpu.pipeline_mode<synchronous>, transform_indices = @transform_4, window_bounds = array<i64: 1, 128>}, {transform_indices = @transform_5, window_bounds = array<i64: 2, 128>}]} {
    %c0 = arith.constant 0 : index
    %c0_0 = arith.constant 0 : index
    %0 = vector.load %arg2[%c0, %c0_0] : memref<4x32xf32, #tpu.memory_space<vmem>>, vector<4x32xf32>
    %c0_1 = arith.constant 0 : index
    %c0_2 = arith.constant 0 : index
    %1 = vector.load %arg3[%c0_1, %c0_2] : memref<1x32xf32, #tpu.memory_space<vmem>>, vector<1x32xf32>
    %c0_i32 = arith.constant 0 : i32
    %c2_i32 = arith.constant 2 : i32
    %2 = arith.addi %c0_i32, %c2_i32 : i32
    %c1_i32 = arith.constant 1 : i32
    scf.for %arg8 = %c0_i32 to %2 step %c1_i32  : i32 {
      %c1_i32_14 = arith.constant 1 : i32
      %11 = arith.muli %arg8, %c1_i32_14 : i32
      %c0_i32_15 = arith.constant 0 : i32
      %12 = arith.addi %c0_i32_15, %11 : i32
      %13 = arith.index_cast %12 : i32 to index
      %c0_16 = arith.constant 0 : index
      %c0_17 = arith.constant 0 : index
      %14 = vector.load %arg1[%13, %c0_16, %c0_17] : memref<2x4x256xf32, #tpu.memory_space<vmem>>, vector<1x4x256xf32>
      %15 = vector.shape_cast %14 : vector<1x4x256xf32> to vector<4x256xf32>
      %cst_18 = arith.constant dense<0.000000e+00> : vector<256x32xf32>
      %16 = tpu.matmul %15, %0, %cst_18 {dimension_numbers = #tpu.dot_dimension_numbers<[0], [0], [1], [1], [0, 1, 1, 1], [], []>} : vector<4x256xf32>, vector<4x32xf32>, vector<256x32xf32> -> vector<256x32xf32>
      %17 = vector.broadcast %1 : vector<1x32xf32> to vector<256x32xf32>
      %18 = arith.addf %16, %17 : vector<256x32xf32>
      %cst_19 = arith.constant 0.000000e+00 : f32
      %19 = vector.broadcast %cst_19 : f32 to vector<256x32xf32>
      %20 = arith.maximumf %18, %19 : vector<256x32xf32>
      %cst_20 = arith.constant dense<0.000000e+00> : vector<32xf32>
      %21 = vector.multi_reduction <add>, %20, %cst_20 [0] : vector<256x32xf32> to vector<32xf32>
      %22 = vector.shape_cast %21 : vector<32xf32> to vector<1x32xf32>
      %23 = arith.index_cast %12 : i32 to index
      %c0_21 = arith.constant 0 : index
      %24 = vector.load %arg7[%23, %c0_21] : memref<2x32xf32, #tpu.memory_space<vmem>>, vector<1x32xf32>
      tpu.vector_store %arg7[%23, %c0_21], %22 {strides = array<i32>} : memref<2x32xf32, #tpu.memory_space<vmem>>, vector<1x32xf32>,
    }
    %c2_i32_3 = arith.constant 2 : i32
    %c0_4 = arith.constant 0 : index
    %c0_5 = arith.constant 0 : index
    %3 = vector.load %arg7[%c0_4, %c0_5] : memref<2x32xf32, #tpu.memory_space<vmem>>, vector<2x32xf32>
    %c0_6 = arith.constant 0 : index
    %c0_7 = arith.constant 0 : index
    %4 = vector.load %arg4[%c0_6, %c0_7] : memref<32x128xf32, #tpu.memory_space<vmem>>, vector<32x128xf32>
    %cst = arith.constant dense<0.000000e+00> : vector<2x128xf32>
    %5 = tpu.matmul %3, %4, %cst {dimension_numbers = #tpu.dot_dimension_numbers<[1], [0], [0], [1], [0, 0, 1, 1], [], []>} : vector<2x32xf32>, vector<32x128xf32>, vector<2x128xf32> -> vector<2x128xf32>
    %c0_8 = arith.constant 0 : index
    %c0_9 = arith.constant 0 : index
    %6 = vector.load %arg5[%c0_8, %c0_9] : memref<1x128xf32, #tpu.memory_space<vmem>>, vector<1x128xf32>
    %7 = vector.broadcast %6 : vector<1x128xf32> to vector<2x128xf32>
    %8 = arith.addf %5, %7 : vector<2x128xf32>
    %c0_10 = arith.constant 0 : index
    %c0_11 = arith.constant 0 : index
    %9 = vector.load %arg6[%c0_10, %c0_11] : memref<2x128xf32, #tpu.memory_space<vmem>>, vector<2x128xf32>
    tpu.vector_store %arg6[%c0_10, %c0_11], %8 {strides = array<i32>} : memref<2x128xf32, #tpu.memory_space<vmem>>, vector<2x128xf32>,
    %c0_12 = arith.constant 0 : index
    %c0_13 = arith.constant 0 : index
    %10 = vector.load %arg6[%c0_12, %c0_13] : memref<2x128xf32, #tpu.memory_space<vmem>>, vector<2x32xf32>
    tpu.vector_store %arg6[%c0_12, %c0_13], %3 {strides = array<i32>} : memref<2x128xf32, #tpu.memory_space<vmem>>, vector<2x32xf32>,
    return
  }
  func.func @transform_0(%arg0: i32) -> (i32, i32, i32) {
    %c0_i32 = arith.constant 0 : i32
    %c0_i32_0 = arith.constant 0 : i32
    %c0_i32_1 = arith.constant 0 : i32
    return %arg0, %c0_i32, %c0_i32_0 : i32, i32, i32
  }
  func.func @transform_1(%arg0: i32) -> (i32, i32) {
    %c0_i32 = arith.constant 0 : i32
    %c0_i32_0 = arith.constant 0 : i32
    %c0_i32_1 = arith.constant 0 : i32
    return %c0_i32, %c0_i32_0 : i32, i32
  }
  func.func @transform_2(%arg0: i32) -> (i32, i32) {
    %c0_i32 = arith.constant 0 : i32
    %c0_i32_0 = arith.constant 0 : i32
    %c0_i32_1 = arith.constant 0 : i32
    return %c0_i32, %c0_i32_0 : i32, i32
  }
  func.func @transform_3(%arg0: i32) -> (i32, i32) {
    %c0_i32 = arith.constant 0 : i32
    %c0_i32_0 = arith.constant 0 : i32
    %c0_i32_1 = arith.constant 0 : i32
    return %c0_i32, %c0_i32_0 : i32, i32
  }
  func.func @transform_4(%arg0: i32) -> (i32, i32) {
    %c0_i32 = arith.constant 0 : i32
    %c0_i32_0 = arith.constant 0 : i32
    %c0_i32_1 = arith.constant 0 : i32
    return %c0_i32, %c0_i32_0 : i32, i32
  }
  func.func @transform_5(%arg0: i32) -> (i32, i32) {
    %c0_i32 = arith.constant 0 : i32
    %c0_i32_0 = arith.constant 0 : i32
    return %arg0, %c0_i32 : i32, i32
  }
}

</mosaic_0001>

<bundles_post_ra>
// kernel: tpu_custom_call.1
= control target key start
LH: loop header
LB: loop body
LE: loop exit
PB: predicated region body
PF: predicated region fallthrough
CT: control target
= control target key end

     0   :  { %10 = vsyncpa [#allocation4], 0  ;;  %s888_s0 = inlined_call_operand.hbm [shape: f32[2,4,256], index: 0, kind: input, shape index: {}]   ;;  %s889_s1 = inlined_call_operand.hbm [shape: f32[4,32], index: 1, kind: input, shape index: {}]   ;;  %s890_s2 = inlined_call_operand.vmem [shape: f32[1,32], index: 2, kind: input, shape index: {}]   ;;  %s891_s3 = inlined_call_operand.hbm [shape: f32[32,128], index: 3, kind: input, shape index: {}]   ;;  %s892_s4 = inlined_call_operand.vmem [shape: f32[1,128], index: 4, kind: input, shape index: {}]   ;;  %s893_s5 = inlined_call_operand.hbm [shape: f32[2,128], index: 5, kind: output, shape index: {}]  }
   0x1   :  { %11 = vsyncpa [#allocation7], 0  ;;  %s31_s20 = sshll.u32 %s889_s1, 4  ;;  %s32_s20 = int_to_ptr.hbm [resolvable:$true] %s31_s20 }
   0x2   :  { %12 = vsyncpa [#allocation5], 0  ;;  %s698_s21 = smov [#allocation6]   ;;  %s17_s25 = sshll.u32 %s888_s0, 4  ;;  %s18_s25 = int_to_ptr.hbm [resolvable:$true] %s17_s25 }
   0x3   :  { %s33_s22 = sshll.u32 %s698_s21, 4  ;;  %s699_s26 = smov [#allocation3]   ;;  %s34_s22 = int_to_ptr.vmem [resolvable:$true] %s33_s22 }
   0x4   :  { %36 = dma.hbm_to_vmem [thread:$0]  %s32_s20, 64, %s34_s22, [#allocation7]  }
   0x5   :  { %s19_s27 = sshll.u32 %s699_s26, 4  ;;  %s700_s28 = smov 128   ;;  %s20_s27 = int_to_ptr.vmem [resolvable:$true] %s19_s27 }
   0x6   :  { %s701_s29 = smov 8   ;;  %s43_s1 = sshll.u32 %s891_s3, 4  ;;  %s44_s1 = int_to_ptr.hbm [resolvable:$true] %s43_s1 }
   0x7   :  { %25 = dma.hbm_to_vmem [thread:$0]  %s18_s25, 256, %s20_s27, [#allocation4], %s700_s28, %s700_s28, %s701_s29  }
   0x8   :  { %s702_s7 = smov [#allocation8]  }
   0x9   :  { %s45_s8 = sshll.u32 %s702_s7, 4  ;;  %s46_s8 = int_to_ptr.vmem [resolvable:$true] %s45_s8 }
   0xa   :  { %51 = dma.hbm_to_vmem [thread:$0]  %s44_s1, 512, %s46_s8, [#allocation7], %s700_s28, %s700_s28, %s701_s29  }
   0xb   :  { %688 = dma.done.wait [#allocation4], 256  }
   0xc   :  { %689 = vsyncadd [#allocation4], 4294967040 }
   0xd   :  { %690 = dma.done.wait [#allocation7], 576  }
   0xe   :  { %691 = vsyncadd [#allocation7], 4294966720  ;;  %v743_v0 = vld [vmem:[#allocation6] sm:$0xf]  ;;  %v748_v1 = vld [vmem:[%s890_s2] sm:$0x1] }
   0xf   :  { %s750_s10 = smov 0  }
  0x10 LB: > { %s568_s3 = sshll.u32 %s696_s10, 3  ;;  %vm248_vm0 = vcmask 1043456   ;;  %vm151_vm1 = vcmask 31744   ;;  %v799_v51 = vperm.slane %v748_v1, 0  ;;  %vm397_vm2 = vcmask 261120   ;;  %s467_s2 = scalar_lea.vmem [#allocation2], %s696_s10  ;;  %s696_s10 = sphi %s750_s10, %s73_s10  }
  0x11   : > { %s76_s11 = scalar_lea.vmem [#allocation3], %s568_s3  ;;  %534 = vmatpush.msk.msra.mxu0 %vm248_vm0, %v743_v0  ;;  %569 = vmatpush.msk.msra.mxu1 %vm248_vm0, %v743_v0  ;;  %vm468_vm3 = vcmask 253952   ;;  %s73_s10 = sadd.s32 1, %s696_s10  }
  0x12   : > { %v77_v2 = vld [vmem:[%s76_s11] sm:$0xff]  ;;  %570 = vmatpush.msk.msra.mxu2 %vm248_vm0, %v743_v0  ;;  %571 = vmatpush.msk.msra.mxu3 %vm248_vm0, %v743_v0  ;;  %p70_p0 = scmp.ge.s32.totalorder %s73_s10, 2  }
  0x13   : > { %82 = vst [vmem:[#allocation1] ss:$2 sm:$0xff] %v77_v2  ;;  %s703_s14 = smov (%p70_p0), [#allocation9]   ;;  %s513_s18 = sshll.u32 (%p70_p0), %s893_s5, 4  ;;  %vm504_vm4 = vcmask (%p70_p0), 254976   ;;  %s514_s18 = int_to_ptr.hbm [resolvable:$true] %s513_s18 }
  0x14   :  { %s511_s15 = sshll.u32 (%p70_p0), %s703_s14, 4  ;;  %s512_s15 = int_to_ptr.vmem [resolvable:$true] %s511_s15 }
  0x1a   : > { %v83_v3 = vld.sshfl [vmem:[#allocation1] sm:$0xff pattern:$0x75316420]  ;;  %v84_v4 = vld.sshfl [vmem:[#allocation1 + $0x8] sm:$0xff pattern:$0x75316420] }
  0x1b   : > { %87 = vxpose.xlu0.b32.start.end [1/1] (short) %v83_v3, 128 }
  0x9b   : > { %119 = vxpose.xlu0.b32.start.end [1/1] (short) %v84_v4, 128 }
  0xbf   : > { %v103_v5 = vpop.trf.xlu0 }
  0xc0   : > { %535 = vmatmul.msk.f32.vlgmr.msra.gmra.mxu0 %vm151_vm1, %v103_v5 }
  0xc7   : > { %v104_v6 = vpop.trf.xlu0 }
  0xc8   : > { %536 = vmatmul.msk.f32.gmra.mxu0 %vm151_vm1, %v104_v6 }
  0xcf   : > { %v105_v7 = vpop.trf.xlu0 }
  0xd0   : > { %537 = vmatmul.msk.f32.gmra.mxu0 %vm151_vm1, %v105_v7 }
  0xd7   : > { %v106_v8 = vpop.trf.xlu0 }
  0xd8   : > { %538 = vmatmul.msk.f32.gmra.mxu0 %vm151_vm1, %v106_v8 }
  0xdf   : > { %v107_v9 = vpop.trf.xlu0 }
  0xe0   : > { %539 = vmatmul.msk.f32.gmra.mxu0 %vm151_vm1, %v107_v9 }
  0xe7   : > { %v108_v10 = vpop.trf.xlu0 }
  0xe8   : > { %540 = vmatmul.msk.f32.gmra.mxu0 %vm151_vm1, %v108_v10 }
  0xef   : > { %v109_v11 = vpop.trf.xlu0 }
  0xf0   : > { %541 = vmatmul.msk.f32.gmra.mxu0 %vm151_vm1, %v109_v11 }
  0xf7   : > { %v110_v12 = vpop.trf.xlu0 }
  0xf8   : > { %542 = vmatmul.msk.f32.gmra.mxu0 %vm151_vm1, %v110_v12 }
  0xff   : > { %v111_v13 = vpop.trf.xlu0 }
 0x100   : > { %543 = vmatmul.msk.f32.vlgmr.msra.gmra.mxu1 %vm151_vm1, %v111_v13 }
 0x107   : > { %v112_v14 = vpop.trf.xlu0 }
 0x108   : > { %544 = vmatmul.msk.f32.gmra.mxu1 %vm151_vm1, %v112_v14 }
 0x10f   : > { %v113_v15 = vpop.trf.xlu0 }
 0x110   : > { %545 = vmatmul.msk.f32.gmra.mxu1 %vm151_vm1, %v113_v15 }
 0x117   : > { %v114_v16 = vpop.trf.xlu0 }
 0x118   : > { %546 = vmatmul.msk.f32.gmra.mxu1 %vm151_vm1, %v114_v16 }
 0x11f   : > { %v115_v17 = vpop.trf.xlu0 }
 0x120   : > { %547 = vmatmul.msk.f32.gmra.mxu1 %vm151_vm1, %v115_v17 }
 0x127   : > { %v116_v18 = vpop.trf.xlu0 }
 0x128   : > { %548 = vmatmul.msk.f32.gmra.mxu1 %vm151_vm1, %v116_v18 }
 0x12f   : > { %v117_v19 = vpop.trf.xlu0 }
 0x130   : > { %549 = vmatmul.msk.f32.gmra.mxu1 %vm151_vm1, %v117_v19 }
 0x137   : > { %v118_v20 = vpop.trf.xlu0 }
 0x138   : > { %550 = vmatmul.msk.f32.gmra.mxu1 %vm151_vm1, %v118_v20 }
 0x13d   : > { %v269_v37 = vpop.f32.mrf.mxu0 }
 0x13e   : > { %v270_v55 = vadd.f32 %v269_v37, %v799_v51 }
 0x13f   : > { %v135_v21 = vpop.trf.xlu0 }
 0x140   : > { %551 = vmatmul.msk.f32.vlgmr.msra.gmra.mxu2 %vm151_vm1, %v135_v21  ;;  %v365_v60 = vmax.f32 %v270_v55, 0.0 }
 0x142   : > { %v398_v6 = vsel %vm397_vm2, %v365_v60, 0.0 }
 0x145   : > { %v272_v38 = vpop.f32.mrf.mxu0 }
 0x146   : > { %v273_v53 = vadd.f32 %v272_v38, %v799_v51 }
 0x147   : > { %v136_v22 = vpop.trf.xlu0 }
 0x148   : > { %552 = vmatmul.msk.f32.gmra.mxu2 %vm151_vm1, %v136_v22  ;;  %v366_v57 = vmax.f32 %v273_v53, 0.0 }
 0x14a   : > { %v399_v63 = vsel %vm397_vm2, %v366_v57, 0.0 }
 0x14b   : > { %v400_v10 = vadd.f32 %v399_v63, %v398_v6 }
 0x14d   : > { %v275_v40 = vpop.f32.mrf.mxu0 }
 0x14e   : > { %v276_v56 = vadd.f32 %v275_v40, %v799_v51 }
 0x14f   : > { %v137_v23 = vpop.trf.xlu0 }
 0x150   : > { %553 = vmatmul.msk.f32.gmra.mxu2 %vm151_vm1, %v137_v23  ;;  %v367_v61 = vmax.f32 %v276_v56, 0.0 }
 0x152   : > { %v401_v7 = vsel %vm397_vm2, %v367_v61, 0.0 }
 0x153   : > { %v402_v15 = vadd.f32 %v401_v7, %v400_v10 }
 0x155   : > { %v278_v42 = vpop.f32.mrf.mxu0 }
 0x156   : > { %v279_v58 = vadd.f32 %v278_v42, %v799_v51 }
 0x157   : > { %v138_v24 = vpop.trf.xlu0 }
 0x158   : > { %554 = vmatmul.msk.f32.gmra.mxu2 %vm151_vm1, %v138_v24  ;;  %v368_v2 = vmax.f32 %v279_v58, 0.0 }
 0x15a   : > { %v403_v12 = vsel %vm397_vm2, %v368_v2, 0.0 }
 0x15b   : > { %v404_v19 = vadd.f32 %v403_v12, %v402_v15 }
 0x15d   : > { %v281_v45 = vpop.f32.mrf.mxu0 }
 0x15e   : > { %v282_v62 = vadd.f32 %v281_v45, %v799_v51 }
 0x15f   : > { %v139_v25 = vpop.trf.xlu0 }
 0x160   : > { %555 = vmatmul.msk.f32.gmra.mxu2 %vm151_vm1, %v139_v25  ;;  %v369_v8 = vmax.f32 %v282_v62, 0.0 }
 0x162   : > { %v405_v16 = vsel %vm397_vm2, %v369_v8, 0.0 }
 0x163   : > { %v406_v24 = vadd.f32 %v405_v16, %v404_v19 }
 0x165   : > { %v284_v48 = vpop.f32.mrf.mxu0 }
 0x166   : > { %v285_v3 = vadd.f32 %v284_v48, %v799_v51 }
 0x167   : > { %v140_v26 = vpop.trf.xlu0 }
 0x168   : > { %556 = vmatmul.msk.f32.gmra.mxu2 %vm151_vm1, %v140_v26  ;;  %v370_v13 = vmax.f32 %v285_v3, 0.0 }
 0x16a   : > { %v407_v21 = vsel %vm397_vm2, %v370_v13, 0.0 }
 0x16d   : > { %v287_v52 = vpop.f32.mrf.mxu0 }
 0x16e   : > { %v288_v9 = vadd.f32 %v287_v52, %v799_v51 }
 0x16f   : > { %v141_v27 = vpop.trf.xlu0 }
 0x170   : > { %557 = vmatmul.msk.f32.gmra.mxu2 %vm151_vm1, %v141_v27  ;;  %v371_v17 = vmax.f32 %v288_v9, 0.0 }
 0x172   : > { %v409_v26 = vsel %vm397_vm2, %v371_v17, 0.0 }
 0x175   : > { %v290_v4 = vpop.f32.mrf.mxu0 }
 0x176   : > { %v291_v14 = vadd.f32 %v290_v4, %v799_v51 }
 0x177   : > { %v142_v28 = vpop.trf.xlu0 }
 0x178   : > { %558 = vmatmul.msk.f32.gmra.mxu2 %vm151_vm1, %v142_v28  ;;  %v372_v22 = vmax.f32 %v291_v14, 0.0 }
 0x17d   : > { %v293_v39 = vpop.f32.mrf.mxu1 }
 0x17e   : > { %v294_v18 = vadd.f32 %v293_v39, %v799_v51 }
 0x17f   : > { %v143_v29 = vpop.trf.xlu0 }
 0x180   : > { %559 = vmatmul.msk.f32.vlgmr.msra.gmra.mxu3 %vm151_vm1, %v143_v29  ;;  %v373_v27 = vmax.f32 %v294_v18, 0.0  ;;  %v408_v29 = vadd.f32 %v407_v21, %v406_v24 }
 0x185   : > { %v296_v41 = vpop.f32.mrf.mxu1 }
 0x186   : > { %v297_v23 = vadd.f32 %v296_v41, %v799_v51 }
 0x187   : > { %v144_v30 = vpop.trf.xlu0 }
 0x188   : > { %560 = vmatmul.msk.f32.gmra.mxu3 %vm151_vm1, %v144_v30  ;;  %v411_v30 = vsel %vm397_vm2, %v372_v22, 0.0 }
 0x18d   : > { %v299_v44 = vpop.f32.mrf.mxu1 }
 0x18e   : > { %v300_v28 = vadd.f32 %v299_v44, %v799_v51 }
 0x18f   : > { %v145_v31 = vpop.trf.xlu0 }
 0x190   : > { %561 = vmatmul.msk.f32.gmra.mxu3 %vm151_vm1, %v145_v31  ;;  %v374_v31 = vmax.f32 %v297_v23, 0.0 }
 0x192   : > { %v415_v39 = vsel %vm397_vm2, %v374_v31, 0.0 }
 0x195   : > { %v302_v47 = vpop.f32.mrf.mxu1 }
 0x197   : > { %v146_v32 = vpop.trf.xlu0 }
 0x198   : > { %562 = vmatmul.msk.f32.gmra.mxu3 %vm151_vm1, %v146_v32  ;;  %v303_v32 = vadd.f32 %v302_v47, %v799_v51 }
 0x19a   : > { %v376_v40 = vmax.f32 %v303_v32, 0.0 }
 0x19c   : > { %v419_v55 = vsel %vm397_vm2, %v376_v40, 0.0 }
 0x19d   : > { %v305_v50 = vpop.f32.mrf.mxu1 }
 0x19e   : > { %v306_v37 = vadd.f32 %v305_v50, %v799_v51 }
 0x19f   : > { %v147_v33 = vpop.trf.xlu0 }
 0x1a0   : > { %563 = vmatmul.msk.f32.gmra.mxu3 %vm151_vm1, %v147_v33  ;;  %v410_v33 = vadd.f32 %v409_v26, %v408_v29  ;;  %v377_v52 = vmax.f32 %v306_v37, 0.0 }
 0x1a2   : > { %v412_v38 = vadd.f32 %v411_v30, %v410_v33  ;;  %v421_v58 = vsel %vm397_vm2, %v377_v52, 0.0 }
 0x1a5   : > { %v308_v59 = vpop.f32.mrf.mxu1 }
 0x1a6   : > { %v309_v41 = vadd.f32 %v308_v59, %v799_v51 }
 0x1a7   : > { %v148_v34 = vpop.trf.xlu0 }
 0x1a8   : > { %564 = vmatmul.msk.f32.gmra.mxu3 %vm151_vm1, %v148_v34  ;;  %v378_v56 = vmax.f32 %v309_v41, 0.0 }
 0x1aa   : > { %v423_v63 = vsel %vm397_vm2, %v378_v56, 0.0 }
 0x1ad   : > { %v311_v20 = vpop.f32.mrf.mxu1 }
 0x1ae   : > { %v312_v47 = vadd.f32 %v311_v20, %v799_v51 }
 0x1af   : > { %v149_v35 = vpop.trf.xlu0 }
 0x1b0   : > { %565 = vmatmul.msk.f32.gmra.mxu3 %vm151_vm1, %v149_v35  ;;  %v413_v35 = vsel %vm397_vm2, %v373_v27, 0.0  ;;  %v379_v60 = vmax.f32 %v312_v47, 0.0 }
 0x1b1   : > { %v414_v42 = vadd.f32 %v413_v35, %v412_v38 }
 0x1b2   : > { %v425_v7 = vsel %vm397_vm2, %v379_v60, 0.0 }
 0x1b3   : > { %v416_v53 = vadd.f32 %v415_v39, %v414_v42 }
 0x1b5   : > { %v314_v44 = vpop.f32.mrf.mxu1 }
 0x1b6   : > { %v315_v50 = vadd.f32 %v314_v44, %v799_v51 }
 0x1b7   : > { %v150_v36 = vpop.trf.xlu0 }
 0x1b8   : > { %566 = vmatmul.msk.f32.gmra.mxu3 %vm151_vm1, %v150_v36  ;;  %v375_v36 = vmax.f32 %v300_v28, 0.0  ;;  %v380_v2 = vmax.f32 %v315_v50, 0.0 }
 0x1ba   : > { %v417_v48 = vsel %vm397_vm2, %v375_v36, 0.0  ;;  %v427_v12 = vsel %vm397_vm2, %v380_v2, 0.0 }
 0x1bb   : > { %v418_v57 = vadd.f32 %v417_v48, %v416_v53 }
 0x1bd   : > { %v420_v61 = vadd.f32 %v419_v55, %v418_v57 }
 0x1bf   : > { %v422_v4 = vadd.f32 %v421_v58, %v420_v61 }
 0x1c1   : > { %v424_v10 = vadd.f32 %v423_v63, %v422_v4 }
 0x1c3   : > { %v792_v43 = vpop.f32.mrf.mxu2  ;;  %v426_v14 = vadd.f32 %v425_v7, %v424_v10 }
 0x1c4   : > { %v318_v59 = vadd.f32 %v792_v43, %v799_v51 }
 0x1c5   : > { %v428_v17 = vadd.f32 %v427_v12, %v426_v14 }
 0x1c6   : > { %v381_v8 = vmax.f32 %v318_v59, 0.0 }
 0x1c8   : > { %v429_v15 = vsel %vm397_vm2, %v381_v8, 0.0 }
 0x1cb   : > { %v794_v46 = vpop.f32.mrf.mxu2 }
 0x1cc   : > { %v321_v3 = vadd.f32 %v794_v46, %v799_v51 }
 0x1ce   : > { %v382_v43 = vmax.f32 %v321_v3, 0.0 }
 0x1d0   : > { %v431_v18 = vsel %vm397_vm2, %v382_v43, 0.0 }
 0x1d3   : > { %v796_v49 = vpop.f32.mrf.mxu2 }
 0x1d4   : > { %v324_v9 = vadd.f32 %v796_v49, %v799_v51  ;;  %v430_v49 = vadd.f32 %v429_v15, %v428_v17 }
 0x1d6   : > { %v383_v16 = vmax.f32 %v324_v9, 0.0  ;;  %v432_v26 = vadd.f32 %v431_v18, %v430_v49 }
 0x1d8   : > { %v433_v23 = vsel %vm397_vm2, %v383_v16, 0.0 }
 0x1d9   : > { %v434_v29 = vadd.f32 %v433_v23, %v432_v26  ;;  %v472_v23 = vld [vmem:[#allocation8 + $0x8] sm:$0xff] (%p70_p0)  ;;  %v587_v26 = vld [vmem:[%s892_s4] ss:$0 sm:$0xff] (%p70_p0) }
 0x1db   : > { %v802_v54 = vpop.f32.mrf.mxu2 }
 0x1dc   : > { %v327_v13 = vadd.f32 %v802_v54, %v799_v51 }
 0x1de   : > { %v384_v19 = vmax.f32 %v327_v13, 0.0 }
 0x1e0   : > { %v435_v27 = vsel %vm397_vm2, %v384_v19, 0.0 }
 0x1e1   : > { %v436_v33 = vadd.f32 %v435_v27, %v434_v29 }
 0x1e3   : > { %v329_v11 = vpop.f32.mrf.mxu2 }
 0x1e4   : > { %v330_v46 = vadd.f32 %v329_v11, %v799_v51 }
 0x1e6   : > { %v385_v24 = vmax.f32 %v330_v46, 0.0 }
 0x1e8   : > { %v437_v30 = vsel %vm397_vm2, %v385_v24, 0.0  ;;  %v471_v24 = vld [vmem:[#allocation8] sm:$0xff] (%p70_p0) }
 0x1e9   : > { %v438_v37 = vadd.f32 %v437_v30, %v436_v33 }
 0x1eb   : > { %v332_v34 = vpop.f32.mrf.mxu2 }
 0x1ec   : > { %v333_v20 = vadd.f32 %v332_v34, %v799_v51 }
 0x1ee   : > { %v386_v28 = vmax.f32 %v333_v20, 0.0 }
 0x1f0   : > { %v439_v34 = vsel %vm397_vm2, %v386_v28, 0.0 }
 0x1f1   : > { %v440_v42 = vadd.f32 %v439_v34, %v438_v37 }
 0x1f3   : > { %v335_v62 = vpop.f32.mrf.mxu2 }
 0x1f4   : > { %v336_v54 = vadd.f32 %v335_v62, %v799_v51 }
 0x1f6   : > { %v387_v31 = vmax.f32 %v336_v54, 0.0 }
 0x1f8   : > { %v441_v39 = vsel %vm397_vm2, %v387_v31, 0.0 }
 0x1f9   : > { %v442_v52 = vadd.f32 %v441_v39, %v440_v42 }
 0x1fb   : > { %v338_v21 = vpop.f32.mrf.mxu2 }
 0x1fc   : > { %v339_v11 = vadd.f32 %v338_v21, %v799_v51 }
 0x1fe   : > { %v388_v35 = vmax.f32 %v339_v11, 0.0 }
 0x200   : > { %v443_v44 = vsel %vm397_vm2, %v388_v35, 0.0 }
 0x203   : > { %v810_v5 = vpop.f32.mrf.mxu3 }
 0x204   : > { %v342_v32 = vadd.f32 %v810_v5, %v799_v51 }
 0x206   : > { %v389_v40 = vmax.f32 %v342_v32, 0.0 }
 0x208   : > { %v445_v47 = vsel %vm397_vm2, %v389_v40, 0.0 }
 0x20b   : > { %v821_v25 = vpop.f32.mrf.mxu3 }
 0x20c   : > { %v345_v36 = vadd.f32 %v821_v25, %v799_v51  ;;  %v444_v25 = vadd.f32 %v443_v44, %v442_v52 }
 0x20e   : > { %v390_v48 = vmax.f32 %v345_v36, 0.0  ;;  %v446_v58 = vadd.f32 %v445_v47, %v444_v25 }
 0x210   : > { %v447_v56 = vsel %vm397_vm2, %v390_v48, 0.0 }
 0x211   : > { %v448_v62 = vadd.f32 %v447_v56, %v446_v58 }
 0x213   : > { %v347_v45 = vpop.f32.mrf.mxu3 }
 0x214   : > { %v348_v41 = vadd.f32 %v347_v45, %v799_v51 }
 0x216   : > { %v391_v53 = vmax.f32 %v348_v41, 0.0 }
 0x218   : > { %v449_v60 = vsel %vm397_vm2, %v391_v53, 0.0 }
 0x219   : > { %v450_v3 = vadd.f32 %v449_v60, %v448_v62 }
 0x21b   : > { %v350_v6 = vpop.f32.mrf.mxu3 }
 0x21c   : > { %v351_v5 = vadd.f32 %v350_v6, %v799_v51 }
 0x21e   : > { %v392_v50 = vmax.f32 %v351_v5, 0.0 }
 0x220   : > { %v451_v63 = vsel %vm397_vm2, %v392_v50, 0.0 }
 0x221   : > { %v452_v7 = vadd.f32 %v451_v63, %v450_v3 }
 0x223   : > { %v353_v22 = vpop.f32.mrf.mxu3 }
 0x224   : > { %v354_v55 = vadd.f32 %v353_v22, %v799_v51  ;;  %v473_v22 = vld [vmem:[#allocation8 + $0x10] sm:$0xff] (%p70_p0) }
 0x226   : > { %v393_v59 = vmax.f32 %v354_v55, 0.0 }
 0x228   : > { %v453_v4 = vsel %vm397_vm2, %v393_v59, 0.0 }
 0x229   : > { %v454_v9 = vadd.f32 %v453_v4, %v452_v7 }
 0x22b   : > { %v356_v38 = vpop.f32.mrf.mxu3 }
 0x22c   : > { %v357_v57 = vadd.f32 %v356_v38, %v799_v51 }
 0x22e   : > { %v394_v2 = vmax.f32 %v357_v57, 0.0 }
 0x230   : > { %v455_v8 = vsel %vm397_vm2, %v394_v2, 0.0 }
 0x231   : > { %v456_v13 = vadd.f32 %v455_v8, %v454_v9 }
 0x233   : > { %v359_v45 = vpop.f32.mrf.mxu3 }
 0x234   : > { %v360_v61 = vadd.f32 %v359_v45, %v799_v51 }
 0x236   : > { %v395_v6 = vmax.f32 %v360_v61, 0.0 }
 0x238   : > { %v457_v12 = vsel %vm397_vm2, %v395_v6, 0.0 }
 0x239   : > { %v458_v15 = vadd.f32 %v457_v12, %v456_v13 }
 0x23b   : > { %v362_v10 = vpop.f32.mrf.mxu3 }
 0x23c   : > { %v363_v43 = vadd.f32 %v362_v10, %v799_v51  ;;  %v474_v51 = vld [vmem:[#allocation8 + $0x18] sm:$0xff] (%p70_p0) }
 0x23d   :  { %495 = vmatpush.msra.mxu0 (%p70_p0), %v474_v51 }
 0x23e   : > { %v396_v14 = vmax.f32 %v363_v43, 0.0 }
 0x23f   :  { %496 = vmatpush.msra.mxu0 (%p70_p0), %v473_v22 }
 0x240   : > { %v459_v16 = vsel %vm397_vm2, %v396_v14, 0.0 }
 0x241   : > { %v460_v46 = vadd.f32 %v459_v16, %v458_v15  ;;  %497 = vmatpush.msra.mxu0 (%p70_p0), %v472_v23 }
 0x243   : > { %v461_v17 = vrot.slane %v460_v46, 4  ;;  %498 = vmatpush.msra.mxu0 (%p70_p0), %v471_v24 }
 0x245   : > { %v462_v18 = vadd.f32 %v461_v17, %v460_v46 }
 0x247   : > { %v463_v19 = vrot.slane %v462_v18, 2 }
 0x249   : > { %v464_v20 = vadd.f32 %v463_v19, %v462_v18 }
 0x24b   : > { %v465_v49 = vrot.slane %v464_v20, 1  ;;  %72 = sbr.rel (!%p70_p0) target bundleno = 16 (0x10), region = 61 }
 0x24d   : > { %v466_v21 = vadd.f32 %v465_v49, %v464_v20 }
 0x24f   : > { %469 = vst.msk [vmem:[%s467_s2] sm:$0x1] %vm468_vm3, %v466_v21 }
 0x256   :  { %v470_v54 = vld [vmem:[#allocation2] sm:$0x3] }
 0x257   :  { %567 = vmatmul.msk.f32.vlgmr.msra.gmra.mxu0 %vm397_vm2, %v470_v54 }
 0x2d4   :  { %v500_v0 = vpop.f32.mrf.mxu0 }
 0x2d5   :  { %v501_v1 = vadd.f32 %v587_v26, %v500_v0 }
 0x2d7   :  { %503 = vst [vmem:[#allocation9] sm:$0x3] %v501_v1 }
 0x2d8   :  { %505 = vst.msk [vmem:[#allocation9] sm:$0x3] %vm504_vm4, %v470_v54 }
 0x2d9   :  { %516 = dma.vmem_to_hbm [thread:$0]  %s512_s15, 32, %s514_s18, [#allocation5]  }
 0x2da   :  { %692 = dma.done.wait [#allocation5], 32  }
 0x2db   :  { %693 = vsyncadd [#allocation5], 4294967264 }
 0x2dc   :  { %521 = vsyncpa [#allocation4], 1 }
 0x2dd   :  { %522 = vsyncpa [#allocation7], 1 }
 0x2de   :  { %523 = vsyncpa [#allocation5], 1 }

</bundles_post_ra>
